<compile_context>
chip_gen: v5e
topology: v5e:2x2
jax: 0.10.0
libtpu: 0.0.40
codegen_flags: <defaults>
</compile_context>

<pallas_src>
import math

import jax
import jax.numpy as jnp
from jax.experimental import pallas as pl
from jax.experimental.pallas import tpu as pltpu

# Small-scale stand-ins for data_shape=[1, 3000], structure=[64,...,2048]
# (same architecture, scaled down).
DATA_SHAPE = [1, 1024]
STRUCTURE = [8, 16, 32, 64, 128, 256]
NEG_SLOPE = 0.1

IN_DIM = math.prod(DATA_SHAPE)
DIMS = [IN_DIM] + STRUCTURE + [IN_DIM]     # in -> hidden... -> in
NUM_LAYERS = len(DIMS) - 1                 # linear layers
NUM_HIDDEN = NUM_LAYERS - 1                # layers followed by LeakyReLU

M_PAD = 8                                  # pad batch (=1) up to one sublane tile
TILE_N = 512                               # final-layer output (lane) tile
VMEM_LIMIT = 32 * 1024 * 1024


def _round_up(x, m):
    return -(-x // m) * m


N_PAD = _round_up(IN_DIM, TILE_N)          # padded final output width (3000 -> 3072)


# --------------------------------------------------------------------------
# Fused kernel: whole hidden stack (VMEM-resident weights) + one
# full-K x TILE_N tile of the final Linear per grid step.
# Grid axis 0 = output-N tiles ("parallel").
# --------------------------------------------------------------------------
def _generator_kernel(*refs):
    # refs = (x, w0, b0, ..., w_{H-1}, b_{H-1}, w_last, b_last, out)
    x_ref = refs[0]
    wl_ref = refs[1 + 2 * NUM_HIDDEN]
    bl_ref = refs[2 + 2 * NUM_HIDDEN]
    o_ref = refs[-1]

    # Hidden stack. Recomputed on every grid step: with M_PAD=8 the MXU work
    # is trivial, the weights are fetched once (constant index_maps), and
    # recomputation keeps both TensorCores correct under the parallel N axis.
    h = x_ref[...]                                           # bf16 (M_PAD, IN_DIM)
    for i in range(NUM_HIDDEN):
        w = refs[1 + 2 * i][...]                             # bf16 (in, out)
        b = refs[2 + 2 * i][...].astype(jnp.float32)         # f32  (1, out)
        acc = jnp.dot(h, w, preferred_element_type=jnp.float32) + b
        acc = jnp.where(acc > 0, acc, NEG_SLOPE * acc)       # LeakyReLU(0.1)
        h = acc.astype(jnp.bfloat16)

    # Final Linear: one (M_PAD, K) x (K, TILE_N) dot, no K reduction axis.
    o_ref[...] = (jnp.dot(h, wl_ref[...], preferred_element_type=jnp.float32)
                  + bl_ref[...].astype(jnp.float32))


# --------------------------------------------------------------------------
# Parameters (nn.Linear-style init), bf16 weights / f32 biases, weight layout
# (in_features, out_features) so kernels compute y = x @ W + b.
# The final layer is padded to N_PAD columns ONCE here (padded cols stay 0).
# --------------------------------------------------------------------------
def init_params(key):
    params = []
    for i in range(NUM_LAYERS):
        fan_in, fan_out = DIMS[i], DIMS[i + 1]
        key, kw, kb = jax.random.split(key, 3)
        bound = 1.0 / math.sqrt(fan_in)
        w = jax.random.uniform(kw, (fan_in, fan_out), jnp.float32, -bound, bound)
        b = jax.random.uniform(kb, (fan_out,), jnp.float32, -bound, bound)
        params.append((w.astype(jnp.bfloat16), b.astype(jnp.float32)))
    return params


def pad_final_params(params):
    """Split params into (hidden_params, padded final w/b).  Done once."""
    w_last, b_last = params[-1]
    K, N = w_last.shape
    w_p = jnp.zeros((K, N_PAD), w_last.dtype).at[:, :N].set(w_last)
    b_p = jnp.zeros((1, N_PAD), b_last.dtype).at[0, :N].set(b_last)
    return params[:-1], (w_p, b_p)


@jax.jit
def generator_forward(z, hidden_params, w_last_p, b_last_p):
    # Module: data = generator(z); data = data.view(data_shape)
    x = z.reshape(1, -1).astype(jnp.bfloat16)                # (1, IN_DIM)
    x = jnp.pad(x, ((0, M_PAD - 1), (0, 0)))                 # (8, IN_DIM), tiny

    flat_args = [x]
    in_specs = [pl.BlockSpec((M_PAD, IN_DIM), lambda n: (0, 0))]
    for w, b in hidden_params:
        flat_args.append(w)
        flat_args.append(b.reshape(1, -1))
        in_specs.append(pl.BlockSpec(w.shape, lambda n: (0, 0)))
        in_specs.append(pl.BlockSpec((1, b.shape[0]), lambda n: (0, 0)))
    flat_args.append(w_last_p)
    flat_args.append(b_last_p)
    in_specs.append(pl.BlockSpec((DIMS[-2], TILE_N), lambda n: (0, n)))
    in_specs.append(pl.BlockSpec((1, TILE_N), lambda n: (0, n)))

    out = pl.pallas_call(
        _generator_kernel,
        out_shape=jax.ShapeDtypeStruct((M_PAD, N_PAD), jnp.float32),
        grid_spec=pltpu.PrefetchScalarGridSpec(
            num_scalar_prefetch=0,
            grid=(N_PAD // TILE_N,),
            in_specs=in_specs,
            out_specs=pl.BlockSpec((M_PAD, TILE_N), lambda n: (0, n)),
        ),
        compiler_params=pltpu.CompilerParams(
            dimension_semantics=("parallel",),
            vmem_limit_bytes=VMEM_LIMIT,
        ),
    )(*flat_args)

    return out[:DATA_SHAPE[0], :IN_DIM].reshape(DATA_SHAPE)


# --------------------------------------------------------------------------
# Pure-JAX reference with identical bf16 quantization (same ops as kernel).
# --------------------------------------------------------------------------
def _reference_forward(z, params):
    h = z.reshape(1, -1).astype(jnp.bfloat16)
    for i, (w, b) in enumerate(params):
        acc = jnp.dot(h, w, preferred_element_type=jnp.float32) + b.astype(jnp.float32)
        if i < len(params) - 1:
            acc = jnp.where(acc > 0, acc, NEG_SLOPE * acc)
            h = acc.astype(jnp.bfloat16)
        else:
            h = acc
    return h.reshape(DATA_SHAPE)


if __name__ == "__main__":
    key = jax.random.PRNGKey(0)
    key, pkey, dkey = jax.random.split(key, 3)

    params = init_params(pkey)
    hidden_params, (w_last_p, b_last_p) = pad_final_params(params)

    # z analogous to the full-scale latent of shape (1, 3000).
    z = jax.random.normal(dkey, tuple(DATA_SHAPE), dtype=jnp.float32)

    out = generator_forward(z, hidden_params, w_last_p, b_last_p)
    out = jax.block_until_ready(out)

    ref = _reference_forward(z, params)
    assert out.shape == tuple(DATA_SHAPE)
    max_err = float(jnp.max(jnp.abs(out - ref)))
    assert jnp.allclose(out, ref, atol=1e-2, rtol=1e-2), max_err

    print("KERNEL_OK")
</pallas_src>

<mosaic_0001>
module attributes {stable_mosaic.version = 11 : i64} {
  func.func @_generator_kernel(%arg0: i32, %arg1: memref<8x1024xbf16, #tpu.memory_space<vmem>>, %arg2: memref<1024x8xbf16, #tpu.memory_space<vmem>>, %arg3: memref<1x8xf32, #tpu.memory_space<vmem>>, %arg4: memref<8x16xbf16, #tpu.memory_space<vmem>>, %arg5: memref<1x16xf32, #tpu.memory_space<vmem>>, %arg6: memref<16x32xbf16, #tpu.memory_space<vmem>>, %arg7: memref<1x32xf32, #tpu.memory_space<vmem>>, %arg8: memref<32x64xbf16, #tpu.memory_space<vmem>>, %arg9: memref<1x64xf32, #tpu.memory_space<vmem>>, %arg10: memref<64x128xbf16, #tpu.memory_space<vmem>>, %arg11: memref<1x128xf32, #tpu.memory_space<vmem>>, %arg12: memref<128x256xbf16, #tpu.memory_space<vmem>>, %arg13: memref<1x256xf32, #tpu.memory_space<vmem>>, %arg14: memref<256x512xbf16, #tpu.memory_space<vmem>>, %arg15: memref<1x512xf32, #tpu.memory_space<vmem>>, %arg16: memref<8x512xf32, #tpu.memory_space<vmem>>) attributes {dimension_semantics = [#tpu.dimension_semantics<parallel>], iteration_bounds = array<i64: 2>, scalar_prefetch = 0 : i64, scratch_operands = 0 : i64, tpu.core_type = #tpu.core_type<tc>, window_params = [{pipeline_mode = #tpu.pipeline_mode<synchronous>, transform_indices = @transform_0, window_bounds = array<i64: 8, 1024>}, {pipeline_mode = #tpu.pipeline_mode<synchronous>, transform_indices = @transform_1, window_bounds = array<i64: 1024, 8>}, {pipeline_mode = #tpu.pipeline_mode<synchronous>, transform_indices = @transform_2, window_bounds = array<i64: 1, 8>}, {pipeline_mode = #tpu.pipeline_mode<synchronous>, transform_indices = @transform_3, window_bounds = array<i64: 8, 16>}, {pipeline_mode = #tpu.pipeline_mode<synchronous>, transform_indices = @transform_4, window_bounds = array<i64: 1, 16>}, {pipeline_mode = #tpu.pipeline_mode<synchronous>, transform_indices = @transform_5, window_bounds = array<i64: 16, 32>}, {pipeline_mode = #tpu.pipeline_mode<synchronous>, transform_indices = @transform_6, window_bounds = array<i64: 1, 32>}, {pipeline_mode = #tpu.pipeline_mode<synchronous>, transform_indices = @transform_7, window_bounds = array<i64: 32, 64>}, {pipeline_mode = #tpu.pipeline_mode<synchronous>, transform_indices = @transform_8, window_bounds = array<i64: 1, 64>}, {pipeline_mode = #tpu.pipeline_mode<synchronous>, transform_indices = @transform_9, window_bounds = array<i64: 64, 128>}, {pipeline_mode = #tpu.pipeline_mode<synchronous>, transform_indices = @transform_10, window_bounds = array<i64: 1, 128>}, {pipeline_mode = #tpu.pipeline_mode<synchronous>, transform_indices = @transform_11, window_bounds = array<i64: 128, 256>}, {pipeline_mode = #tpu.pipeline_mode<synchronous>, transform_indices = @transform_12, window_bounds = array<i64: 1, 256>}, {transform_indices = @transform_13, window_bounds = array<i64: 256, 512>}, {transform_indices = @transform_14, window_bounds = array<i64: 1, 512>}, {transform_indices = @transform_15, window_bounds = array<i64: 8, 512>}]} {
    %c0 = arith.constant 0 : index
    %c0_0 = arith.constant 0 : index
    %0 = vector.load %arg1[%c0, %c0_0] : memref<8x1024xbf16, #tpu.memory_space<vmem>>, vector<8x1024xbf16>
    %c0_1 = arith.constant 0 : index
    %c0_2 = arith.constant 0 : index
    %1 = vector.load %arg2[%c0_1, %c0_2] : memref<1024x8xbf16, #tpu.memory_space<vmem>>, vector<1024x8xbf16>
    %c0_3 = arith.constant 0 : index
    %c0_4 = arith.constant 0 : index
    %2 = vector.load %arg3[%c0_3, %c0_4] : memref<1x8xf32, #tpu.memory_space<vmem>>, vector<1x8xf32>
    %cst = arith.constant dense<0.000000e+00> : vector<8x8xf32>
    %3 = tpu.matmul %0, %1, %cst {dimension_numbers = #tpu.dot_dimension_numbers<[1], [0], [0], [1], [0, 0, 1, 1], [], []>} : vector<8x1024xbf16>, vector<1024x8xbf16>, vector<8x8xf32> -> vector<8x8xf32>
    %4 = vector.broadcast %2 : vector<1x8xf32> to vector<8x8xf32>
    %5 = arith.addf %3, %4 : vector<8x8xf32>
    %cst_5 = arith.constant 0.000000e+00 : f32
    %6 = vector.broadcast %cst_5 : f32 to vector<8x8xf32>
    %7 = arith.cmpf ogt, %5, %6 : vector<8x8xf32>
    %cst_6 = arith.constant 1.000000e-01 : f32
    %8 = vector.broadcast %cst_6 : f32 to vector<8x8xf32>
    %9 = arith.mulf %8, %5 : vector<8x8xf32>
    %10 = arith.select %7, %5, %9 : vector<8x8xi1>, vector<8x8xf32>
    %11 = arith.truncf %10 : vector<8x8xf32> to vector<8x8xbf16>
    %c0_7 = arith.constant 0 : index
    %c0_8 = arith.constant 0 : index
    %12 = vector.load %arg4[%c0_7, %c0_8] : memref<8x16xbf16, #tpu.memory_space<vmem>>, vector<8x16xbf16>
    %c0_9 = arith.constant 0 : index
    %c0_10 = arith.constant 0 : index
    %13 = vector.load %arg5[%c0_9, %c0_10] : memref<1x16xf32, #tpu.memory_space<vmem>>, vector<1x16xf32>
    %cst_11 = arith.constant dense<0.000000e+00> : vector<8x16xf32>
    %14 = tpu.matmul %11, %12, %cst_11 {dimension_numbers = #tpu.dot_dimension_numbers<[1], [0], [0], [1], [0, 0, 1, 1], [], []>} : vector<8x8xbf16>, vector<8x16xbf16>, vector<8x16xf32> -> vector<8x16xf32>
    %15 = vector.broadcast %13 : vector<1x16xf32> to vector<8x16xf32>
    %16 = arith.addf %14, %15 : vector<8x16xf32>
    %cst_12 = arith.constant 0.000000e+00 : f32
    %17 = vector.broadcast %cst_12 : f32 to vector<8x16xf32>
    %18 = arith.cmpf ogt, %16, %17 : vector<8x16xf32>
    %cst_13 = arith.constant 1.000000e-01 : f32
    %19 = vector.broadcast %cst_13 : f32 to vector<8x16xf32>
    %20 = arith.mulf %19, %16 : vector<8x16xf32>
    %21 = arith.select %18, %16, %20 : vector<8x16xi1>, vector<8x16xf32>
    %22 = arith.truncf %21 : vector<8x16xf32> to vector<8x16xbf16>
    %c0_14 = arith.constant 0 : index
    %c0_15 = arith.constant 0 : index
    %23 = vector.load %arg6[%c0_14, %c0_15] : memref<16x32xbf16, #tpu.memory_space<vmem>>, vector<16x32xbf16>
    %c0_16 = arith.constant 0 : index
    %c0_17 = arith.constant 0 : index
    %24 = vector.load %arg7[%c0_16, %c0_17] : memref<1x32xf32, #tpu.memory_space<vmem>>, vector<1x32xf32>
    %cst_18 = arith.constant dense<0.000000e+00> : vector<8x32xf32>
    %25 = tpu.matmul %22, %23, %cst_18 {dimension_numbers = #tpu.dot_dimension_numbers<[1], [0], [0], [1], [0, 0, 1, 1], [], []>} : vector<8x16xbf16>, vector<16x32xbf16>, vector<8x32xf32> -> vector<8x32xf32>
    %26 = vector.broadcast %24 : vector<1x32xf32> to vector<8x32xf32>
    %27 = arith.addf %25, %26 : vector<8x32xf32>
    %cst_19 = arith.constant 0.000000e+00 : f32
    %28 = vector.broadcast %cst_19 : f32 to vector<8x32xf32>
    %29 = arith.cmpf ogt, %27, %28 : vector<8x32xf32>
    %cst_20 = arith.constant 1.000000e-01 : f32
    %30 = vector.broadcast %cst_20 : f32 to vector<8x32xf32>
    %31 = arith.mulf %30, %27 : vector<8x32xf32>
    %32 = arith.select %29, %27, %31 : vector<8x32xi1>, vector<8x32xf32>
    %33 = arith.truncf %32 : vector<8x32xf32> to vector<8x32xbf16>
    %c0_21 = arith.constant 0 : index
    %c0_22 = arith.constant 0 : index
    %34 = vector.load %arg8[%c0_21, %c0_22] : memref<32x64xbf16, #tpu.memory_space<vmem>>, vector<32x64xbf16>
    %c0_23 = arith.constant 0 : index
    %c0_24 = arith.constant 0 : index
    %35 = vector.load %arg9[%c0_23, %c0_24] : memref<1x64xf32, #tpu.memory_space<vmem>>, vector<1x64xf32>
    %cst_25 = arith.constant dense<0.000000e+00> : vector<8x64xf32>
    %36 = tpu.matmul %33, %34, %cst_25 {dimension_numbers = #tpu.dot_dimension_numbers<[1], [0], [0], [1], [0, 0, 1, 1], [], []>} : vector<8x32xbf16>, vector<32x64xbf16>, vector<8x64xf32> -> vector<8x64xf32>
    %37 = vector.broadcast %35 : vector<1x64xf32> to vector<8x64xf32>
    %38 = arith.addf %36, %37 : vector<8x64xf32>
    %cst_26 = arith.constant 0.000000e+00 : f32
    %39 = vector.broadcast %cst_26 : f32 to vector<8x64xf32>
    %40 = arith.cmpf ogt, %38, %39 : vector<8x64xf32>
    %cst_27 = arith.constant 1.000000e-01 : f32
    %41 = vector.broadcast %cst_27 : f32 to vector<8x64xf32>
    %42 = arith.mulf %41, %38 : vector<8x64xf32>
    %43 = arith.select %40, %38, %42 : vector<8x64xi1>, vector<8x64xf32>
    %44 = arith.truncf %43 : vector<8x64xf32> to vector<8x64xbf16>
    %c0_28 = arith.constant 0 : index
    %c0_29 = arith.constant 0 : index
    %45 = vector.load %arg10[%c0_28, %c0_29] : memref<64x128xbf16, #tpu.memory_space<vmem>>, vector<64x128xbf16>
    %c0_30 = arith.constant 0 : index
    %c0_31 = arith.constant 0 : index
    %46 = vector.load %arg11[%c0_30, %c0_31] : memref<1x128xf32, #tpu.memory_space<vmem>>, vector<1x128xf32>
    %cst_32 = arith.constant dense<0.000000e+00> : vector<8x128xf32>
    %47 = tpu.matmul %44, %45, %cst_32 {dimension_numbers = #tpu.dot_dimension_numbers<[1], [0], [0], [1], [0, 0, 1, 1], [], []>} : vector<8x64xbf16>, vector<64x128xbf16>, vector<8x128xf32> -> vector<8x128xf32>
    %48 = vector.broadcast %46 : vector<1x128xf32> to vector<8x128xf32>
    %49 = arith.addf %47, %48 : vector<8x128xf32>
    %cst_33 = arith.constant 0.000000e+00 : f32
    %50 = vector.broadcast %cst_33 : f32 to vector<8x128xf32>
    %51 = arith.cmpf ogt, %49, %50 : vector<8x128xf32>
    %cst_34 = arith.constant 1.000000e-01 : f32
    %52 = vector.broadcast %cst_34 : f32 to vector<8x128xf32>
    %53 = arith.mulf %52, %49 : vector<8x128xf32>
    %54 = arith.select %51, %49, %53 : vector<8x128xi1>, vector<8x128xf32>
    %55 = arith.truncf %54 : vector<8x128xf32> to vector<8x128xbf16>
    %c0_35 = arith.constant 0 : index
    %c0_36 = arith.constant 0 : index
    %56 = vector.load %arg12[%c0_35, %c0_36] : memref<128x256xbf16, #tpu.memory_space<vmem>>, vector<128x256xbf16>
    %c0_37 = arith.constant 0 : index
    %c0_38 = arith.constant 0 : index
    %57 = vector.load %arg13[%c0_37, %c0_38] : memref<1x256xf32, #tpu.memory_space<vmem>>, vector<1x256xf32>
    %cst_39 = arith.constant dense<0.000000e+00> : vector<8x256xf32>
    %58 = tpu.matmul %55, %56, %cst_39 {dimension_numbers = #tpu.dot_dimension_numbers<[1], [0], [0], [1], [0, 0, 1, 1], [], []>} : vector<8x128xbf16>, vector<128x256xbf16>, vector<8x256xf32> -> vector<8x256xf32>
    %59 = vector.broadcast %57 : vector<1x256xf32> to vector<8x256xf32>
    %60 = arith.addf %58, %59 : vector<8x256xf32>
    %cst_40 = arith.constant 0.000000e+00 : f32
    %61 = vector.broadcast %cst_40 : f32 to vector<8x256xf32>
    %62 = arith.cmpf ogt, %60, %61 : vector<8x256xf32>
    %cst_41 = arith.constant 1.000000e-01 : f32
    %63 = vector.broadcast %cst_41 : f32 to vector<8x256xf32>
    %64 = arith.mulf %63, %60 : vector<8x256xf32>
    %65 = arith.select %62, %60, %64 : vector<8x256xi1>, vector<8x256xf32>
    %66 = arith.truncf %65 : vector<8x256xf32> to vector<8x256xbf16>
    %c0_42 = arith.constant 0 : index
    %c0_43 = arith.constant 0 : index
    %67 = vector.load %arg14[%c0_42, %c0_43] : memref<256x512xbf16, #tpu.memory_space<vmem>>, vector<256x512xbf16>
    %cst_44 = arith.constant dense<0.000000e+00> : vector<8x512xf32>
    %68 = tpu.matmul %66, %67, %cst_44 {dimension_numbers = #tpu.dot_dimension_numbers<[1], [0], [0], [1], [0, 0, 1, 1], [], []>} : vector<8x256xbf16>, vector<256x512xbf16>, vector<8x512xf32> -> vector<8x512xf32>
    %c0_45 = arith.constant 0 : index
    %c0_46 = arith.constant 0 : index
    %69 = vector.load %arg15[%c0_45, %c0_46] : memref<1x512xf32, #tpu.memory_space<vmem>>, vector<1x512xf32>
    %70 = vector.broadcast %69 : vector<1x512xf32> to vector<8x512xf32>
    %71 = arith.addf %68, %70 : vector<8x512xf32>
    %c0_47 = arith.constant 0 : index
    %c0_48 = arith.constant 0 : index
    %72 = vector.load %arg16[%c0_47, %c0_48] : memref<8x512xf32, #tpu.memory_space<vmem>>, vector<8x512xf32>
    tpu.vector_store %arg16[%c0_47, %c0_48], %71 {strides = array<i32>} : memref<8x512xf32, #tpu.memory_space<vmem>>, vector<8x512xf32>,
    return
  }
  func.func @transform_0(%arg0: i32) -> (i32, i32) {
    %c0_i32 = arith.constant 0 : i32
    %c0_i32_0 = arith.constant 0 : i32
    %c0_i32_1 = arith.constant 0 : i32
    return %c0_i32, %c0_i32_0 : i32, i32
  }
  func.func @transform_1(%arg0: i32) -> (i32, i32) {
    %c0_i32 = arith.constant 0 : i32
    %c0_i32_0 = arith.constant 0 : i32
    %c0_i32_1 = arith.constant 0 : i32
    return %c0_i32, %c0_i32_0 : i32, i32
  }
  func.func @transform_2(%arg0: i32) -> (i32, i32) {
    %c0_i32 = arith.constant 0 : i32
    %c0_i32_0 = arith.constant 0 : i32
    %c0_i32_1 = arith.constant 0 : i32
    return %c0_i32, %c0_i32_0 : i32, i32
  }
  func.func @transform_3(%arg0: i32) -> (i32, i32) {
    %c0_i32 = arith.constant 0 : i32
    %c0_i32_0 = arith.constant 0 : i32
    %c0_i32_1 = arith.constant 0 : i32
    return %c0_i32, %c0_i32_0 : i32, i32
  }
  func.func @transform_4(%arg0: i32) -> (i32, i32) {
    %c0_i32 = arith.constant 0 : i32
    %c0_i32_0 = arith.constant 0 : i32
    %c0_i32_1 = arith.constant 0 : i32
    return %c0_i32, %c0_i32_0 : i32, i32
  }
  func.func @transform_5(%arg0: i32) -> (i32, i32) {
    %c0_i32 = arith.constant 0 : i32
    %c0_i32_0 = arith.constant 0 : i32
    %c0_i32_1 = arith.constant 0 : i32
    return %c0_i32, %c0_i32_0 : i32, i32
  }
  func.func @transform_6(%arg0: i32) -> (i32, i32) {
    %c0_i32 = arith.constant 0 : i32
    %c0_i32_0 = arith.constant 0 : i32
    %c0_i32_1 = arith.constant 0 : i32
    return %c0_i32, %c0_i32_0 : i32, i32
  }
  func.func @transform_7(%arg0: i32) -> (i32, i32) {
    %c0_i32 = arith.constant 0 : i32
    %c0_i32_0 = arith.constant 0 : i32
    %c0_i32_1 = arith.constant 0 : i32
    return %c0_i32, %c0_i32_0 : i32, i32
  }
  func.func @transform_8(%arg0: i32) -> (i32, i32) {
    %c0_i32 = arith.constant 0 : i32
    %c0_i32_0 = arith.constant 0 : i32
    %c0_i32_1 = arith.constant 0 : i32
    return %c0_i32, %c0_i32_0 : i32, i32
  }
  func.func @transform_9(%arg0: i32) -> (i32, i32) {
    %c0_i32 = arith.constant 0 : i32
    %c0_i32_0 = arith.constant 0 : i32
    %c0_i32_1 = arith.constant 0 : i32
    return %c0_i32, %c0_i32_0 : i32, i32
  }
  func.func @transform_10(%arg0: i32) -> (i32, i32) {
    %c0_i32 = arith.constant 0 : i32
    %c0_i32_0 = arith.constant 0 : i32
    %c0_i32_1 = arith.constant 0 : i32
    return %c0_i32, %c0_i32_0 : i32, i32
  }
  func.func @transform_11(%arg0: i32) -> (i32, i32) {
    %c0_i32 = arith.constant 0 : i32
    %c0_i32_0 = arith.constant 0 : i32
    %c0_i32_1 = arith.constant 0 : i32
    return %c0_i32, %c0_i32_0 : i32, i32
  }
  func.func @transform_12(%arg0: i32) -> (i32, i32) {
    %c0_i32 = arith.constant 0 : i32
    %c0_i32_0 = arith.constant 0 : i32
    %c0_i32_1 = arith.constant 0 : i32
    return %c0_i32, %c0_i32_0 : i32, i32
  }
  func.func @transform_13(%arg0: i32) -> (i32, i32) {
    %c0_i32 = arith.constant 0 : i32
    %c0_i32_0 = arith.constant 0 : i32
    return %c0_i32, %arg0 : i32, i32
  }
  func.func @transform_14(%arg0: i32) -> (i32, i32) {
    %c0_i32 = arith.constant 0 : i32
    %c0_i32_0 = arith.constant 0 : i32
    return %c0_i32, %arg0 : i32, i32
  }
  func.func @transform_15(%arg0: i32) -> (i32, i32) {
    %c0_i32 = arith.constant 0 : i32
    %c0_i32_0 = arith.constant 0 : i32
    return %c0_i32, %arg0 : i32, i32
  }
}

</mosaic_0001>

<bundles_post_ra>
// kernel: generator_forward.1
= control target key start
LH: loop header
LB: loop body
LE: loop exit
PB: predicated region body
PF: predicated region fallthrough
CT: control target
= control target key end

     0   :  { %s3604_s0 = inlined_call_operand.vmem [shape: bf16[8,1024], index: 0, kind: input, shape index: {}]   ;;  %s3605_s1 = inlined_call_operand.vmem [shape: bf16[1024,8], index: 1, kind: input, shape index: {}]   ;;  %s3606_s2 = inlined_call_operand.vmem [shape: f32[1,8], index: 2, kind: input, shape index: {}]   ;;  %s3607_s3 = inlined_call_operand.vmem [shape: bf16[8,16], index: 3, kind: input, shape index: {}]   ;;  %s3608_s4 = inlined_call_operand.vmem [shape: f32[1,16], index: 4, kind: input, shape index: {}]   ;;  %s3609_s5 = inlined_call_operand.vmem [shape: bf16[16,32], index: 5, kind: input, shape index: {}]   ;;  %s3610_s6 = inlined_call_operand.vmem [shape: f32[1,32], index: 6, kind: input, shape index: {}]   ;;  %s3611_s7 = inlined_call_operand.vmem [shape: bf16[32,64], index: 7, kind: input, shape index: {}]   ;;  %s3612_s8 = inlined_call_operand.vmem [shape: f32[1,64], index: 8, kind: input, shape index: {}]   ;;  %s3613_s9 = inlined_call_operand.vmem [shape: bf16[64,128], index: 9, kind: input, shape index: {}]   ;;  %s3614_s10 = inlined_call_operand.vmem [shape: f32[1,128], index: 10, kind: input, shape index: {}]   ;;  %s3615_s11 = inlined_call_operand.vmem [shape: bf16[128,256], index: 11, kind: input, shape index: {}]   ;;  %s3616_s12 = inlined_call_operand.vmem [shape: f32[1,256], index: 12, kind: input, shape index: {}]   ;;  %s3617_s13 = inlined_call_operand.hbm [shape: bf16[256,1024], index: 13, kind: input, shape index: {}]   ;;  %s3618_s14 = inlined_call_operand.vmem [shape: f32[1,1024], index: 14, kind: input, shape index: {}]   ;;  %s3619_s15 = inlined_call_operand.vmem [shape: f32[8,1024], index: 15, kind: output, shape index: {}]  }
   0x1   :  { %3624 = sst [smem:[#allocation8_spill]] %s3618_s14 }
   0x2   :  { %3625 = sst [smem:[#allocation9_spill]] %s3619_s15 }
   0x3   :  { %20 = vsyncpa [#allocation3], 0 }
   0x4   :  { %22 = vsyncpa [#allocation3 + $0x1], 0  ;;  %s3040_s18 = smov 0   ;;  %s3042_s19 = smov 0  }
   0x5   :  { %s3044_s20 = smov 0   ;;  %s3046_s21 = smov 0  }
   0x6 LB: > { %3626 = sst [smem:[#allocation5_spill]] %s2951_s20  ;;  %s3622_s22 = sadd.s32 4294967295, %s2955_s21   ;;  %s2955_s21 = sphi %s3046_s21, %s3635_s21   ;;  %s2951_s20 = sphi %s3044_s20, %s3640_s20   ;;  %s2947_s19 = sphi %s3042_s19, %s3639_s19   ;;  %s2943_s18 = sphi %s3040_s18, %s3638_s18  }
   0x7   : > { %s3060_s23 = sadd.s32 1, %s2955_s21   ;;  %s308_s25 = sadd.s32 1, %s2951_s20 }
   0x8   : > { %3627 = sst [smem:[#allocation6_spill]] %s3060_s23  ;;  %s305_s24 = ssub.s32 %s2955_s21, %s3060_s23 }
   0x9   : > { %p306_p0 = scmp.eq.s32.totalorder %s305_s24, 0  ;;  %p315_p1 = scmp.ne.s32.totalorder %s2951_s20, %s2947_s19 }
   0xa   : > { %p316_p2 = scmp.eq.s32.totalorder %s2955_s21, 0  ;;  %p321_p3 = scmp.ne.s32.totalorder %s2947_s19, %s2943_s18 }
   0xb   : > { %s3070_s26 = scalar_select %p306_p0, %s2951_s20, %s308_s25  }
   0xc   : > { %p3072_p4 = por %p316_p2, %p315_p1  ;;  %p322_p5 = scmp.eq.s32.totalorder %s3622_s22, 0 }
   0xd   : > { %3628 = sst [smem:[#allocation7_spill]] %s3070_s26  ;;  %p2850_p6 = scmp.lt.s32.totalorder %s2955_s21, 2 }
   0xe   : > { %p3079_p7 = por %p322_p5, %p321_p3  ;;  %s436_s29 = sand.u32 1, %s2951_s20  }
   0xf   : > { %s2074_s30 = sshll.u32 %s436_s29, 9  ;;  %s2692_s16 = sshll.u32 %s2955_s21, 4 }
  0x10   : > { %s445_s18 = scalar_lea.hbm %s3617_s13, %s2692_s16  ;;  %s440_s25 = scalar_lea.vmem [#allocation2], %s2074_s30 }
  0x11   : > { %s448_s26 = sshll.u32 %s440_s25, 4  ;;  %s446_s23 = sshll.u32 %s445_s18, 4  ;;  %s449_s26 = int_to_ptr.vmem [resolvable:$true] %s448_s26  ;;  %s447_s23 = int_to_ptr.hbm [resolvable:$true] %s446_s23 }
  0x12   : > { %p3090_p8 = pnand %p2850_p6, %p3072_p4  ;;  %s437_s15 = scalar_lea.sflag [#allocation3], %s436_s29 }
  0x13   : > { %s2891_s14 = sshra.s32 %s447_s23, 4  ;;  %s2898_s17 = scalar_lea.hbm %s3617_s13, 1024  ;;  %s2892_s14 = int_to_ptr.hbm [resolvable:$true] %s2891_s14 }
  0x14   : > { %s2893_s20 = scalar_lea.hbm %s2892_s14, 512  ;;  %p2895_p10 = pneg %p3090_p8 }
  0x15   : > { %p2894_p9 = scmp.ne.s32.totalorder %s2892_s14, %s2893_s20  ;;  %p2899_p13 = scmp.lt.s32.totalorder %s2892_s14, %s3617_s13 }
  0x16   : > { %p2900_p0 = scmp.lt.s32.totalorder %s2898_s17, %s2893_s20 }
  0x17   : > { %p2896_p11 = pnand %p2895_p10, %p2894_p9 }
  0x18   : > { %p2901_p1 = por %p2900_p0, %p2899_p13 }
  0x19   : > { %p2897_p12 = pneg %p2896_p11 }
  0x1b   : > { %p2902_p2 = pnand %p2901_p1, %p2897_p12 }
  0x1d   : > { %2905 = shalt.err (!%p2902_p2)
}
  0x1e   : > { %s2957_s29 = smov 512   ;;  %s2958_s18 = smov 256  }
  0x1f   : > { %s2959_s25 = smov 16   ;;  %p2077_p3 = scmp.ge.s32.totalorder %s2955_s21, 1 }
  0x20   : > { %2849 = dma.hbm_to_vmem [thread:$0]  (!%p3090_p8), %s447_s23, 8192, %s449_s26, %s437_s15, %s2957_s29, %s2958_s18, %s2959_s25  }
  0x21   : > { %p464_p4 = scmp.lt.s32.totalorder %s2955_s21, 3 }
  0x23   : > { %p465_p5 = pnand %p2077_p3, %p464_p4 }
  0x24   : > { %s470_s30 = sand.u32 (!%p465_p5), 1, %s2947_s19  }
  0x25   : > { %468 = sbr.rel (%p465_p5) target bundleno = 1095 (0x447), region = 80  ;;  %s2078_s14 = sshll.u32 (!%p465_p5), %s470_s30, 9 }
  0x26   : > { %s471_s20 = scalar_lea.sflag (!%p465_p5), [#allocation3], %s470_s30  ;;  %s3107_s16 = scalar_lea.vmem (!%p465_p5), [#allocation2], %s2078_s14 }
  0x2a   : > { %2938 = dma.done.wait (%p3079_p7), %s471_s20, 8192  }
  0x2b   : > { %2940 = vsyncadd (%p3079_p7), %s471_s20, 4294959104  ;;  %v2700_v0 = vld [vmem:[%s3605_s1 + $0x38] sm:$0xff]  ;;  %v2699_v4 = vld [vmem:[%s3605_s1 + $0x30] sm:$0xff]  ;;  %vm1204_vm0 = vcmask 1043456   ;;  %vm1200_vm2 = vcmask 64512   ;;  %vm1237_vm4 = vcmask 130048  }
  0x2c   : > { %v2708_v1 = vld [vmem:[%s3605_s1 + $0x78] sm:$0xff]  ;;  %1087 = vmatpush.bf16.msra.mxu0 %v2700_v0  ;;  %v2707_v5 = vld [vmem:[%s3605_s1 + $0x70] sm:$0xff]  ;;  %v2698_v8 = vld [vmem:[%s3605_s1 + $0x28] sm:$0xff]  ;;  %vm1278_vm6 = vcmask 261120   ;;  %vm1335_vm8 = vcmask 523264   ;;  %s3633_s29 = sld [smem:[#allocation8_spill]] }
  0x2d   : > { %v2716_v2 = vld [vmem:[%s3605_s1 + $0xb8] sm:$0xff]  ;;  %1100 = vmatpush.bf16.msra.mxu1 %v2708_v1  ;;  %v2715_v6 = vld [vmem:[%s3605_s1 + $0xb0] sm:$0xff]  ;;  %v2706_v9 = vld [vmem:[%s3605_s1 + $0x68] sm:$0xff] }
  0x2e   : > { %v2724_v3 = vld [vmem:[%s3605_s1 + $0xf8] sm:$0xff]  ;;  %1113 = vmatpush.bf16.msra.mxu2 %v2716_v2  ;;  %v2723_v7 = vld [vmem:[%s3605_s1 + $0xf0] sm:$0xff]  ;;  %v2714_v10 = vld [vmem:[%s3605_s1 + $0xa8] sm:$0xff] }
  0x2f   : > { %1126 = vmatpush.bf16.msra.mxu3 %v2724_v3  ;;  %v2722_v11 = vld [vmem:[%s3605_s1 + $0xe8] sm:$0xff]  ;;  %v2697_v12 = vld [vmem:[%s3605_s1 + $0x20] sm:$0xff]  ;;  %v2696_v16 = vld [vmem:[%s3605_s1 + $0x18] sm:$0xff] }
  0x30   : > { %1088 = vmatpush.bf16.msra.mxu0 %v2699_v4  ;;  %v2705_v13 = vld [vmem:[%s3605_s1 + $0x60] sm:$0xff]  ;;  %v2704_v17 = vld [vmem:[%s3605_s1 + $0x58] sm:$0xff]  ;;  %v2695_v20 = vld [vmem:[%s3605_s1 + $0x10] sm:$0xff] }
  0x31   : > { %1101 = vmatpush.bf16.msra.mxu1 %v2707_v5  ;;  %v2713_v14 = vld [vmem:[%s3605_s1 + $0xa0] sm:$0xff]  ;;  %v2712_v18 = vld [vmem:[%s3605_s1 + $0x98] sm:$0xff]  ;;  %v2703_v21 = vld [vmem:[%s3605_s1 + $0x50] sm:$0xff] }
  0x32   : > { %1114 = vmatpush.bf16.msra.mxu2 %v2715_v6  ;;  %v2721_v15 = vld [vmem:[%s3605_s1 + $0xe0] sm:$0xff]  ;;  %v2720_v19 = vld [vmem:[%s3605_s1 + $0xd8] sm:$0xff]  ;;  %v2711_v22 = vld [vmem:[%s3605_s1 + $0x90] sm:$0xff] }
  0x33   : > { %1127 = vmatpush.bf16.msra.mxu3 %v2723_v7  ;;  %v2719_v23 = vld [vmem:[%s3605_s1 + $0xd0] sm:$0xff]  ;;  %v2694_v24 = vld [vmem:[%s3605_s1 + $0x8] sm:$0xff]  ;;  %v539_v29 = vld [vmem:[%s3604_s0] sm:$0xff] }
  0x34   : > { %1089 = vmatpush.bf16.msra.mxu0 %v2698_v8  ;;  %v2702_v25 = vld [vmem:[%s3605_s1 + $0x48] sm:$0xff]  ;;  %v2693_v30 = vld [vmem:[%s3605_s1] sm:$0xff]  ;;  %v679_v33 = vunpack.c.l.b16 %v539_v29  ;;  %v680_v37 = vunpack.c.h.b16 %v539_v29  ;;  %v2732_v38 = vld [vmem:[%s3605_s1 + $0x138] sm:$0xff] }
  0x35   : > { %1102 = vmatpush.bf16.msra.mxu1 %v2706_v9  ;;  %v2710_v26 = vld [vmem:[%s3605_s1 + $0x88] sm:$0xff]  ;;  %v2701_v31 = vld [vmem:[%s3605_s1 + $0x40] sm:$0xff]  ;;  %v2740_v39 = vld [vmem:[%s3605_s1 + $0x178] sm:$0xff] }
  0x36   : > { %1115 = vmatpush.bf16.msra.mxu2 %v2714_v10  ;;  %v2718_v27 = vld [vmem:[%s3605_s1 + $0xc8] sm:$0xff]  ;;  %v2709_v34 = vld [vmem:[%s3605_s1 + $0x80] sm:$0xff]  ;;  %v2748_v40 = vld [vmem:[%s3605_s1 + $0x1b8] sm:$0xff]  ;;  %v687_v43 = vpack.c.b16 %v679_v33, %v679_v33  ;;  %v688_v45 = vpack.c.b16 %v680_v37, %v680_v37 }
  0x37   : > { %1128 = vmatpush.bf16.msra.mxu3 %v2722_v11  ;;  %v540_v28 = vld [vmem:[%s3604_s0 + $0x8] sm:$0xff]  ;;  %v2717_v35 = vld [vmem:[%s3605_s1 + $0xc0] sm:$0xff]  ;;  %v2756_v41 = vld [vmem:[%s3605_s1 + $0x1f8] sm:$0xff] }
  0x38   : > { %1090 = vmatpush.bf16.msra.mxu0 %v2697_v12  ;;  %v681_v32 = vunpack.c.l.b16 %v540_v28  ;;  %v682_v36 = vunpack.c.h.b16 %v540_v28  ;;  %v2731_v46 = vld [vmem:[%s3605_s1 + $0x130] sm:$0xff]  ;;  %v2730_v50 = vld [vmem:[%s3605_s1 + $0x128] sm:$0xff]  ;;  %v2729_v54 = vld [vmem:[%s3605_s1 + $0x120] sm:$0xff] }
  0x39   : > { %1103 = vmatpush.bf16.msra.mxu1 %v2705_v13  ;;  %v2739_v47 = vld [vmem:[%s3605_s1 + $0x170] sm:$0xff]  ;;  %v2738_v51 = vld [vmem:[%s3605_s1 + $0x168] sm:$0xff]  ;;  %v2737_v55 = vld [vmem:[%s3605_s1 + $0x160] sm:$0xff] }
  0x3a   : > { %1116 = vmatpush.bf16.msra.mxu2 %v2713_v14  ;;  %v689_v42 = vpack.c.b16 %v681_v32, %v681_v32  ;;  %v690_v44 = vpack.c.b16 %v682_v36, %v682_v36  ;;  %v2747_v48 = vld [vmem:[%s3605_s1 + $0x1b0] sm:$0xff]  ;;  %v2746_v52 = vld [vmem:[%s3605_s1 + $0x1a8] sm:$0xff]  ;;  %v2745_v56 = vld [vmem:[%s3605_s1 + $0x1a0] sm:$0xff] }
  0x3b   : > { %1129 = vmatpush.bf16.msra.mxu3 %v2721_v15  ;;  %v2755_v49 = vld [vmem:[%s3605_s1 + $0x1f0] sm:$0xff]  ;;  %v2754_v53 = vld [vmem:[%s3605_s1 + $0x1e8] sm:$0xff]  ;;  %v2753_v57 = vld [vmem:[%s3605_s1 + $0x1e0] sm:$0xff] }
  0x3c   : > { %1091 = vmatpush.bf16.msra.mxu0 %v2696_v16  ;;  %v2728_v58 = vld [vmem:[%s3605_s1 + $0x118] sm:$0xff]  ;;  %v2727_v62 = vld [vmem:[%s3605_s1 + $0x110] sm:$0xff]  ;;  %v2726_v2 = vld [vmem:[%s3605_s1 + $0x108] sm:$0xff] }
  0x3d   : > { %1104 = vmatpush.bf16.msra.mxu1 %v2704_v17  ;;  %v2736_v59 = vld [vmem:[%s3605_s1 + $0x158] sm:$0xff]  ;;  %v2735_v63 = vld [vmem:[%s3605_s1 + $0x150] sm:$0xff]  ;;  %v2734_v3 = vld [vmem:[%s3605_s1 + $0x148] sm:$0xff] }
  0x3e   : > { %1117 = vmatpush.bf16.msra.mxu2 %v2712_v18  ;;  %v2744_v60 = vld [vmem:[%s3605_s1 + $0x198] sm:$0xff]  ;;  %v2743_v0 = vld [vmem:[%s3605_s1 + $0x190] sm:$0xff]  ;;  %v2742_v5 = vld [vmem:[%s3605_s1 + $0x188] sm:$0xff] }
  0x3f   : > { %1130 = vmatpush.bf16.msra.mxu3 %v2720_v19  ;;  %v2752_v61 = vld [vmem:[%s3605_s1 + $0x1d8] sm:$0xff]  ;;  %v2751_v1 = vld [vmem:[%s3605_s1 + $0x1d0] sm:$0xff]  ;;  %v2750_v6 = vld [vmem:[%s3605_s1 + $0x1c8] sm:$0xff] }
  0x40   : > { %1092 = vmatpush.bf16.msra.mxu0 %v2695_v20  ;;  %v541_v4 = vld [vmem:[%s3604_s0 + $0x10] sm:$0xff]  ;;  %v542_v7 = vld [vmem:[%s3604_s0 + $0x18] sm:$0xff]  ;;  %v2725_v10 = vld [vmem:[%s3605_s1 + $0x100] sm:$0xff] }
  0x41   : > { %1105 = vmatpush.bf16.msra.mxu1 %v2703_v21  ;;  %v683_v8 = vunpack.c.l.b16 %v541_v4  ;;  %v684_v9 = vunpack.c.h.b16 %v541_v4  ;;  %v2733_v11 = vld [vmem:[%s3605_s1 + $0x140] sm:$0xff]  ;;  %v685_v12 = vunpack.c.l.b16 %v542_v7  ;;  %v686_v13 = vunpack.c.h.b16 %v542_v7  ;;  %v2428_v7 = vld [vmem:[%s3615_s11 + $0x70] sm:$0xf] }
  0x42   : > { %1118 = vmatpush.bf16.msra.mxu2 %v2711_v22  ;;  %v2741_v14 = vld [vmem:[%s3605_s1 + $0x180] sm:$0xff] }
  0x43   : > { %1131 = vmatpush.bf16.msra.mxu3 %v2719_v23  ;;  %v2749_v15 = vld [vmem:[%s3605_s1 + $0x1c0] sm:$0xff]  ;;  %v691_v16 = vpack.c.b16 %v683_v8, %v683_v8  ;;  %v692_v17 = vpack.c.b16 %v684_v9, %v684_v9  ;;  %v693_v18 = vpack.c.b16 %v685_v12, %v685_v12  ;;  %v694_v19 = vpack.c.b16 %v686_v13, %v686_v13  ;;  %v2779_v8 = vld [vmem:[%s3615_s11 + $0x74] sm:$0xf0]  ;;  %v2778_v9 = vld [vmem:[%s3615_s11 + $0x74] sm:$0xf] }
  0x44   : > { %1093 = vmatpush.bf16.msra.mxu0 %v2694_v24  ;;  %v1195_v21 = vld [vmem:[%s3607_s3] sm:$0xf]  ;;  %v2777_v13 = vld [vmem:[%s3615_s11 + $0x64] sm:$0xf0] }
  0x45   : > { %1106 = vmatpush.bf16.msra.mxu1 %v2702_v25  ;;  %v1206_v23 = vsel %vm1204_vm0, %v1195_v21, 0  ;;  %v2886_v28 = vld [vmem:[%s3606_s2] ss:$0 sm:$0xff]  ;;  %v2774_v21 = vld [vmem:[%s3615_s11 + $0x54] sm:$0xf] }
  0x46   : > { %1119 = vmatpush.bf16.msra.mxu2 %v2710_v26  ;;  %v2420_v12 = vld [vmem:[%s3615_s11 + $0x60] sm:$0xf] }
  0x47   : > { %1132 = vmatpush.bf16.msra.mxu3 %v2718_v27 }
  0x48   : > { %1094 = vmatpush.bf16.msra.mxu0 %v2693_v30  ;;  %v2757_v30 = vld [vmem:[%s3609_s5] sm:$0xff] }
  0x49   : > { %1107 = vmatpush.bf16.msra.mxu1 %v2701_v31 }
  0x4a   : > { %1120 = vmatpush.bf16.msra.mxu2 %v2709_v34 }
  0x4b   : > { %1133 = vmatpush.bf16.msra.mxu3 %v2717_v35  ;;  %1095 = vmatmul.bf16.vlgmr.msra.gmra.mxu0 %v687_v43 }
  0x4c   : > { %1139 = vmatpush.bf16.msrb.mxu0 %v2732_v38  ;;  %1108 = vmatmul.bf16.vlgmr.msra.gmra.mxu1 %v688_v45 }
  0x4d   : > { %1152 = vmatpush.bf16.msrb.mxu1 %v2740_v39  ;;  %1121 = vmatmul.bf16.vlgmr.msra.gmra.mxu2 %v689_v42 }
  0x4e   : > { %1165 = vmatpush.bf16.msrb.mxu2 %v2748_v40  ;;  %1134 = vmatmul.bf16.vlgmr.msra.gmra.mxu3 %v690_v44 }
  0x4f   : > { %1178 = vmatpush.bf16.msrb.mxu3 %v2756_v41 }
  0x50   : > { %1140 = vmatpush.bf16.msrb.mxu0 %v2731_v46 }
  0x51   : > { %1153 = vmatpush.bf16.msrb.mxu1 %v2739_v47 }
  0x52   : > { %1166 = vmatpush.bf16.msrb.mxu2 %v2747_v48 }
  0x53   : > { %1179 = vmatpush.bf16.msrb.mxu3 %v2755_v49 }
  0x54   : > { %1141 = vmatpush.bf16.msrb.mxu0 %v2730_v50 }
  0x55   : > { %1154 = vmatpush.bf16.msrb.mxu1 %v2738_v51  ;;  %v2759_v51 = vld [vmem:[%s3611_s7 + $0x8] sm:$0xff] }
  0x56   : > { %1167 = vmatpush.bf16.msrb.mxu2 %v2746_v52  ;;  %v2887_v52 = vld [vmem:[%s3608_s4] ss:$0 sm:$0xff] }
  0x57   : > { %1180 = vmatpush.bf16.msrb.mxu3 %v2754_v53 }
  0x58   : > { %1142 = vmatpush.bf16.msrb.mxu0 %v2729_v54 }
  0x59   : > { %1155 = vmatpush.bf16.msrb.mxu1 %v2737_v55 }
  0x5a   : > { %1168 = vmatpush.bf16.msrb.mxu2 %v2745_v56 }
  0x5b   : > { %1181 = vmatpush.bf16.msrb.mxu3 %v2753_v57 }
  0x5c   : > { %1143 = vmatpush.bf16.msrb.mxu0 %v2728_v58 }
  0x5d   : > { %1156 = vmatpush.bf16.msrb.mxu1 %v2736_v59  ;;  %v2758_v59 = vld [vmem:[%s3611_s7] sm:$0xff] }
  0x5e   : > { %1169 = vmatpush.bf16.msrb.mxu2 %v2744_v60  ;;  %v2763_v60 = vld [vmem:[%s3613_s9 + $0x18] sm:$0xff] }
  0x5f   : > { %1182 = vmatpush.bf16.msrb.mxu3 %v2752_v61  ;;  %v2762_v61 = vld [vmem:[%s3613_s9 + $0x10] sm:$0xff] }
  0x60   : > { %1144 = vmatpush.bf16.msrb.mxu0 %v2727_v62  ;;  %v2888_v62 = vld [vmem:[%s3610_s6] ss:$0 sm:$0xff] }
  0x61   : > { %1157 = vmatpush.bf16.msrb.mxu1 %v2735_v63 }
  0x62   : > { %1170 = vmatpush.bf16.msrb.mxu2 %v2743_v0 }
  0x63   : > { %1183 = vmatpush.bf16.msrb.mxu3 %v2751_v1 }
  0x64   : > { %1145 = vmatpush.bf16.msrb.mxu0 %v2726_v2 }
  0x65   : > { %1158 = vmatpush.bf16.msrb.mxu1 %v2734_v3 }
  0x66   : > { %1171 = vmatpush.bf16.msrb.mxu2 %v2742_v5  ;;  %v2761_v5 = vld [vmem:[%s3613_s9 + $0x8] sm:$0xff] }
  0x67   : > { %1184 = vmatpush.bf16.msrb.mxu3 %v2750_v6  ;;  %v2760_v6 = vld [vmem:[%s3613_s9] sm:$0xff] }
  0x68   : > { %1146 = vmatpush.bf16.msrb.mxu0 %v2725_v10  ;;  %v2429_v10 = vor.u32 %v2779_v8, %v2428_v7  ;;  %v2840_v7 = vld [vmem:[%s3107_s16 + $0x1e4] sm:$0xf]  ;;  %v2678_v8 = vld [vmem:[%s3107_s16 + $0x1f0] sm:$0xf0] }
  0x69   : > { %1159 = vmatpush.bf16.msrb.mxu1 %v2733_v11  ;;  %v2430_v11 = vld [vmem:[%s3615_s11 + $0x78] sm:$0xf0] }
  0x6a   : > { %1172 = vmatpush.bf16.msrb.mxu2 %v2741_v14  ;;  %v2433_v14 = vor.u32 %v2778_v9, %v2430_v11  ;;  %v2532_v9 = vld [vmem:[%s3107_s16 + $0xc0] sm:$0xf]  ;;  %v2806_v11 = vld [vmem:[%s3107_s16 + $0xcc] sm:$0xf0] }
  0x6b   : > { %1185 = vmatpush.bf16.msrb.mxu3 %v2749_v15  ;;  %1147 = vmatmul.bf16.vlgmr.msrb.gmra.mxu0 %v691_v16  ;;  %v2776_v15 = vld [vmem:[%s3615_s11 + $0x64] sm:$0xf]  ;;  %v2422_v16 = vld [vmem:[%s3615_s11 + $0x68] sm:$0xf0] }
  0x6c   : > { %1160 = vmatmul.bf16.vlgmr.msrb.gmra.mxu1 %v692_v17  ;;  %1458 = vmatpush.bf16.msra.mxu0 %v2429_v10  ;;  %v2421_v17 = vor.u32 %v2777_v13, %v2420_v12  ;;  %v2681_v10 = vor.u32 %v2840_v7, %v2678_v8  ;;  %v2660_v12 = vld [vmem:[%s3107_s16 + $0x1c0] sm:$0xf]  ;;  %v2838_v13 = vld [vmem:[%s3107_s16 + $0x1cc] sm:$0xf0] }
  0x6d   : > { %1173 = vmatmul.bf16.vlgmr.msrb.gmra.mxu2 %v693_v18  ;;  %1471 = vmatpush.bf16.msra.mxu1 %v2433_v14  ;;  %v2425_v18 = vor.u32 %v2776_v15, %v2422_v16  ;;  %v2533_v14 = vor.u32 %v2806_v11, %v2532_v9  ;;  %v2661_v15 = vor.u32 %v2838_v13, %v2660_v12  ;;  %v2804_v16 = vld [vmem:[%s3107_s16 + $0xc4] sm:$0xf]  ;;  %v2786_v7 = vld [vmem:[%s3107_s16 + $0x2c] sm:$0xf0]  ;;  %v2580_v8 = vld [vmem:[%s3107_s16 + $0x120] sm:$0xf] }
  0x6e   : > { %1186 = vmatmul.bf16.vlgmr.msrb.gmra.mxu3 %v694_v19  ;;  %1215 = vmatpush.bf16.msra.mxu2 %v1206_v23  ;;  %v2412_v19 = vld [vmem:[%s3615_s11 + $0x50] sm:$0xf]  ;;  %v2784_v11 = vld [vmem:[%s3107_s16 + $0x24] sm:$0xf]  ;;  %v2454_v12 = vld [vmem:[%s3107_s16 + $0x30] sm:$0xf0] }
  0x6f   : > { %1248 = vmatpush.bf16.msra.mxu3 %v2757_v30  ;;  %v2816_v13 = vld [vmem:[%s3107_s16 + $0x124] sm:$0xf] }
  0x70   : > { %1459 = vmatpush.bf16.msra.mxu0 %v2421_v17  ;;  %v2534_v17 = vld [vmem:[%s3107_s16 + $0xd0] sm:$0xf0] }
  0x71   : > { %1472 = vmatpush.bf16.msra.mxu1 %v2425_v18  ;;  %v2836_v18 = vld [vmem:[%s3107_s16 + $0x1c4] sm:$0xf] }
  0x72   : > { %1288 = vmatpush.bf16.msrb.mxu2 %v2759_v51  ;;  %v2767_v51 = vld [vmem:[%s3615_s11 + $0x14] sm:$0xf0] }
  0x73   : > { %1343 = vmatpush.bf16.msrb.mxu3 %v2763_v60  ;;  %v2374_v60 = vld [vmem:[%s3615_s11 + $0x8] sm:$0xf0] }
  0x76   : > { %1289 = vmatpush.bf16.msrb.mxu2 %v2758_v59 }
  0x77   : > { %1344 = vmatpush.bf16.msrb.mxu3 %v2762_v61 }
  0x7b   : > { %1345 = vmatpush.bf16.msrb.mxu3 %v2761_v5 }
  0x7f   : > { %1346 = vmatpush.bf16.msrb.mxu3 %v2760_v6 }
  0xc8   : > { %v1096_v20 = vpop.f32.mrf.mxu0 }
  0xc9   : > { %v1109_v22 = vpop.f32.mrf.mxu1  ;;  %v1097_v32 = vadd.f32 %v2886_v28, %v1096_v20  ;;  %v2775_v20 = vld [vmem:[%s3615_s11 + $0x54] sm:$0xf0]  ;;  %v2406_v28 = vld [vmem:[%s3615_s11 + $0x48] sm:$0xf0] }
  0xca   : > { %v2413_v23 = vor.u32 %v2775_v20, %v2412_v19  ;;  %v2537_v19 = vor.u32 %v2804_v16, %v2534_v17  ;;  %v2662_v20 = vld [vmem:[%s3107_s16 + $0x1d0] sm:$0xf0]  ;;  %v2436_v16 = vld [vmem:[%s3107_s16] sm:$0xf] }
  0xcb   : > { %v1110_v33 = vadd.f32 %v1109_v22, %v1097_v32  ;;  %v2414_v22 = vld [vmem:[%s3615_s11 + $0x58] sm:$0xf0]  ;;  %v2771_v32 = vld [vmem:[%s3615_s11 + $0x34] sm:$0xf0] }
  0xcc   : > { %1460 = vmatpush.bf16.msra.mxu0 %v2413_v23  ;;  %v2665_v23 = vor.u32 %v2836_v18, %v2662_v20  ;;  %v2782_v20 = vld [vmem:[%s3107_s16 + $0xc] sm:$0xf0] }
  0xd0   : > { %v1122_v24 = vpop.f32.mrf.mxu2  ;;  %v1098_v26 = vpop.f32.mrf.mxu0 }
  0xd1   : > { %v1135_v25 = vpop.f32.mrf.mxu3  ;;  %v1111_v27 = vpop.f32.mrf.mxu1  ;;  %v1123_v34 = vadd.f32 %v1122_v24, %v1110_v33  ;;  %v2417_v24 = vor.u32 %v2774_v21, %v2414_v22  ;;  %v2773_v26 = vld [vmem:[%s3615_s11 + $0x44] sm:$0xf0]  ;;  %v2770_v33 = vld [vmem:[%s3615_s11 + $0x34] sm:$0xf]  ;;  %v2516_v21 = vld [vmem:[%s3107_s16 + $0xa0] sm:$0xf] }
  0xd2   : > { %v2772_v27 = vld [vmem:[%s3615_s11 + $0x44] sm:$0xf]  ;;  %v2802_v22 = vld [vmem:[%s3107_s16 + $0xac] sm:$0xf0] }
  0xd3   : > { %v1136_v35 = vadd.f32 %v1135_v25, %v1123_v34  ;;  %v2404_v25 = vld [vmem:[%s3615_s11 + $0x40] sm:$0xf]  ;;  %1473 = vmatpush.bf16.msra.mxu1 %v2417_v24  ;;  %v2409_v30 = vor.u32 %v2772_v27, %v2406_v28  ;;  %v2398_v34 = vld [vmem:[%s3615_s11 + $0x38] sm:$0xf0]  ;;  %v2517_v27 = vor.u32 %v2802_v22, %v2516_v21  ;;  %v2518_v28 = vld [vmem:[%s3107_s16 + $0xb0] sm:$0xf0] }
  0xd4   : > { %v2644_v24 = vld [vmem:[%s3107_s16 + $0x1a0] sm:$0xf]  ;;  %v2814_v22 = vld [vmem:[%s3107_s16 + $0x10c] sm:$0xf0] }
  0xd5   : > { %v2564_v21 = vld [vmem:[%s3107_s16 + $0x100] sm:$0xf] }
  0xd7   : > { %1474 = vmatpush.bf16.msra.mxu1 %v2409_v30  ;;  %v2646_v30 = vld [vmem:[%s3107_s16 + $0x1b0] sm:$0xf0] }
  0xd8   : > { %v1124_v29 = vpop.f32.mrf.mxu2 }
  0xd9   : > { %v1137_v31 = vpop.f32.mrf.mxu3  ;;  %v2405_v29 = vor.u32 %v2773_v26, %v2404_v25  ;;  %v2834_v25 = vld [vmem:[%s3107_s16 + $0x1ac] sm:$0xf0]  ;;  %v2800_v26 = vld [vmem:[%s3107_s16 + $0xa4] sm:$0xf] }
  0xda   : > { %v2396_v31 = vld [vmem:[%s3615_s11 + $0x30] sm:$0xf] }
  0xdb   : > { %1461 = vmatpush.bf16.msra.mxu0 %v2405_v29  ;;  %v2832_v29 = vld [vmem:[%s3107_s16 + $0x1a4] sm:$0xf] }
  0xe8   : > { %v1148_v36 = vpop.f32.mrf.mxu0 }
  0xe9   : > { %v1161_v37 = vpop.f32.mrf.mxu1  ;;  %v1149_v38 = vadd.f32 %v1148_v36, %v1136_v35  ;;  %v2397_v35 = vor.u32 %v2771_v32, %v2396_v31  ;;  %v2401_v36 = vor.u32 %v2770_v33, %v2398_v34  ;;  %v2645_v31 = vor.u32 %v2834_v25, %v2644_v24  ;;  %v2500_v33 = vld [vmem:[%s3107_s16 + $0x80] sm:$0xf]  ;;  %v2798_v34 = vld [vmem:[%s3107_s16 + $0x8c] sm:$0xf0]  ;;  %v2780_v25 = vld [vmem:[%s3107_s16 + $0x4] sm:$0xf] }
  0xea   : > { %v2521_v32 = vor.u32 %v2800_v26, %v2518_v28  ;;  %v2438_v26 = vld [vmem:[%s3107_s16 + $0x10] sm:$0xf0] }
  0xeb   : > { %v1162_v39 = vadd.f32 %v1161_v37, %v1149_v38  ;;  %v2388_v37 = vld [vmem:[%s3615_s11 + $0x20] sm:$0xf]  ;;  %v2769_v38 = vld [vmem:[%s3615_s11 + $0x24] sm:$0xf0]  ;;  %1462 = vmatpush.bf16.msra.mxu0 %v2397_v35  ;;  %1475 = vmatpush.bf16.msra.mxu1 %v2401_v36  ;;  %v2649_v36 = vor.u32 %v2832_v29, %v2646_v30  ;;  %v2566_v28 = vld [vmem:[%s3107_s16 + $0x110] sm:$0xf0] }
  0xec   : > { %v2628_v35 = vld [vmem:[%s3107_s16 + $0x180] sm:$0xf]  ;;  %v2556_v29 = vld [vmem:[%s3107_s16 + $0xe8] sm:$0xf]  ;;  %v2811_v30 = vld [vmem:[%s3107_s16 + $0xf4] sm:$0xf0] }
  0xf0   : > { %v1174_v40 = vpop.f32.mrf.mxu2  ;;  %v1150_v43 = vpop.f32.mrf.mxu0 }
  0xf1   : > { %v1187_v41 = vpop.f32.mrf.mxu3  ;;  %v1175_v42 = vadd.f32 %v1174_v40, %v1162_v39  ;;  %v1163_v44 = vpop.f32.mrf.mxu1  ;;  %v2768_v39 = vld [vmem:[%s3615_s11 + $0x24] sm:$0xf]  ;;  %v2390_v40 = vld [vmem:[%s3615_s11 + $0x28] sm:$0xf0]  ;;  %v2889_v43 = vld [vmem:[%s3612_s8] ss:$0 sm:$0xff] }
  0xf3   : > { %v1188_v45 = vadd.f32 %v1187_v41, %v1175_v42  ;;  %v2389_v41 = vor.u32 %v2769_v38, %v2388_v37  ;;  %v2393_v42 = vor.u32 %v2768_v39, %v2390_v40  ;;  %v2830_v37 = vld [vmem:[%s3107_s16 + $0x18c] sm:$0xf0]  ;;  %v2796_v38 = vld [vmem:[%s3107_s16 + $0x84] sm:$0xf]  ;;  %v2502_v39 = vld [vmem:[%s3107_s16 + $0x90] sm:$0xf0] }
  0xf4   : > { %v2828_v40 = vld [vmem:[%s3107_s16 + $0x184] sm:$0xf] }
  0xf5   : > { %vm1191_vm1 = vcmp.gt.f32.partialorder %v1188_v45, 0.0  ;;  %v1192_v46 = vmul.f32 0.1, %v1188_v45  ;;  %1463 = vmatpush.bf16.msra.mxu0 %v2389_v41  ;;  %1476 = vmatpush.bf16.msra.mxu1 %v2393_v42  ;;  %v2630_v41 = vld [vmem:[%s3107_s16 + $0x190] sm:$0xf0]  ;;  %v2501_v42 = vor.u32 %v2798_v34, %v2500_v33 }
  0xf6   : > { %v2684_v33 = vld [vmem:[%s3107_s16 + $0x1e8] sm:$0xf]  ;;  %v2843_v34 = vld [vmem:[%s3107_s16 + $0x1f4] sm:$0xf0] }
  0xf7   : > { %v1193_v47 = vsel %vm1191_vm1, %v1188_v45, %v1192_v46 }
  0xf8   : > { %v1194_v48 = vpack.c.bf16 %v1193_v47, %v1193_v47  ;;  %v1176_v49 = vpop.f32.mrf.mxu2 }
  0xf9   : > { %v1189_v50 = vpop.f32.mrf.mxu3 }
  0xfa   : > { %2338 = vmatmul.msk.bf16.vlgmr.msra.gmra.mxu2 %vm1200_vm2, %v1194_v48  ;;  %v2380_v50 = vld [vmem:[%s3615_s11 + $0x10] sm:$0xf] }
 0x17d   : > { %v1217_v53 = vpop.f32.mrf.mxu2 }
 0x17e   : > { %v1218_v54 = vadd.f32 %v2887_v52, %v1217_v53  ;;  %v2766_v52 = vld [vmem:[%s3615_s11 + $0x14] sm:$0xf]  ;;  %v2381_v53 = vor.u32 %v2767_v51, %v2380_v50  ;;  %v2792_v50 = vld [vmem:[%s3107_s16 + $0x64] sm:$0xf] }
 0x17f   : > { %v2486_v51 = vld [vmem:[%s3107_s16 + $0x70] sm:$0xf0] }
 0x180   : > { %vm1221_vm3 = vcmp.gt.f32.partialorder %v1218_v54, 0.0  ;;  %v1222_v55 = vmul.f32 0.1, %v1218_v54  ;;  %1464 = vmatpush.bf16.msra.mxu0 %v2381_v53  ;;  %v2614_v53 = vld [vmem:[%s3107_s16 + $0x170] sm:$0xf0] }
 0x182   : > { %v1223_v56 = vsel %vm1221_vm3, %v1218_v54, %v1222_v55  ;;  %v2382_v54 = vld [vmem:[%s3615_s11 + $0x18] sm:$0xf0] }
 0x183   : > { %v1224_v57 = vpack.c.bf16 %v1223_v56, %v1223_v56  ;;  %v2385_v55 = vor.u32 %v2766_v52, %v2382_v54  ;;  %v2372_v56 = vld [vmem:[%s3615_s11] sm:$0xf]  ;;  %v2824_v52 = vld [vmem:[%s3107_s16 + $0x164] sm:$0xf] }
 0x185   : > { %v1219_v58 = vpop.f32.mrf.mxu2  ;;  %2343 = vmatmul.msk.bf16.vlgmr.msra.gmra.mxu3 %vm1237_vm4, %v1224_v57  ;;  %1477 = vmatpush.bf16.msra.mxu1 %v2385_v55  ;;  %v2765_v57 = vld [vmem:[%s3615_s11 + $0x4] sm:$0xf0] }
 0x186   : > { %v2764_v58 = vld [vmem:[%s3615_s11 + $0x4] sm:$0xf]  ;;  %v2373_v59 = vor.u32 %v2765_v57, %v2372_v56  ;;  %v2489_v56 = vor.u32 %v2792_v50, %v2486_v51  ;;  %v2468_v57 = vld [vmem:[%s3107_s16 + $0x40] sm:$0xf] }
 0x187   : > { %v2377_v61 = vor.u32 %v2764_v58, %v2374_v60  ;;  %v2790_v58 = vld [vmem:[%s3107_s16 + $0x4c] sm:$0xf0]  ;;  %v2617_v60 = vor.u32 %v2824_v52, %v2614_v53  ;;  %v2839_v52 = vld [vmem:[%s3107_s16 + $0x1d4] sm:$0xf0]  ;;  %v2805_v53 = vld [vmem:[%s3107_s16 + $0xcc] sm:$0xf] }
 0x188   : > { %1465 = vmatpush.bf16.msra.mxu0 %v2373_v59  ;;  %v2596_v59 = vld [vmem:[%s3107_s16 + $0x140] sm:$0xf] }
 0x189   : > { %1478 = vmatpush.bf16.msra.mxu1 %v2377_v61  ;;  %v2822_v61 = vld [vmem:[%s3107_s16 + $0x14c] sm:$0xf0] }
 0x18d   : > { %1925 = vmatpush.bf16.msrb.mxu1 %v2681_v10  ;;  %v2818_v10 = vld [vmem:[%s3107_s16 + $0x12c] sm:$0xf0] }
 0x18e   : > { %v2581_v18 = vor.u32 %v2818_v10, %v2580_v8  ;;  %v2799_v10 = vld [vmem:[%s3107_s16 + $0x94] sm:$0xf0] }
 0x191   : > { %1926 = vmatpush.bf16.msrb.mxu1 %v2665_v23 }
 0x195   : > { %1927 = vmatpush.bf16.msrb.mxu1 %v2649_v36  ;;  %v2558_v36 = vld [vmem:[%s3107_s16 + $0xf8] sm:$0xf0] }
 0x208   : > { %v1250_v63 = vpop.f32.mrf.mxu3 }
 0x209   : > { %v1251_v0 = vadd.f32 %v2888_v62, %v1250_v63  ;;  %v2548_v62 = vld [vmem:[%s3107_s16 + $0xe0] sm:$0xf]  ;;  %v2810_v63 = vld [vmem:[%s3107_s16 + $0xec] sm:$0xf0] }
 0x20b   : > { %vm1254_vm5 = vcmp.gt.f32.partialorder %v1251_v0, 0.0  ;;  %v1255_v1 = vmul.f32 0.1, %v1251_v0 }
 0x20d   : > { %v1256_v2 = vsel %vm1254_vm5, %v1251_v0, %v1255_v1  ;;  %v2676_v0 = vld [vmem:[%s3107_s16 + $0x1e0] sm:$0xf]  ;;  %v2549_v1 = vor.u32 %v2810_v63, %v2548_v62  ;;  %v2788_v62 = vld [vmem:[%s3107_s16 + $0x44] sm:$0xf]  ;;  %v2470_v63 = vld [vmem:[%s3107_s16 + $0x50] sm:$0xf0] }
 0x20e   : > { %v1257_v3 = vpack.c.bf16 %v1256_v2, %v1256_v2  ;;  %v2842_v2 = vld [vmem:[%s3107_s16 + $0x1ec] sm:$0xf0] }
 0x20f   : > { %v2677_v5 = vor.u32 %v2842_v2, %v2676_v0  ;;  %1886 = vmatpush.bf16.msra.mxu2 %v2549_v1  ;;  %v2820_v0 = vld [vmem:[%s3107_s16 + $0x144] sm:$0xf]  ;;  %v2598_v1 = vld [vmem:[%s3107_s16 + $0x150] sm:$0xf0]  ;;  %v2890_v2 = vld [vmem:[%s3614_s10] ss:$0 sm:$0xff] }
 0x210   : > { %v1252_v4 = vpop.f32.mrf.mxu3  ;;  %2352 = vmatmul.msk.bf16.vlgmr.msrb.gmra.mxu2 %vm1278_vm6, %v1257_v3  ;;  %v2808_v3 = vld [vmem:[%s3107_s16 + $0xe4] sm:$0xf]  ;;  %v2601_v9 = vor.u32 %v2820_v0, %v2598_v1  ;;  %v2835_v1 = vld [vmem:[%s3107_s16 + $0x1b4] sm:$0xf0] }
 0x211   : > { %v2550_v4 = vld [vmem:[%s3107_s16 + $0xf0] sm:$0xf0]  ;;  %1899 = vmatpush.bf16.msra.mxu3 %v2677_v5  ;;  %v2473_v5 = vor.u32 %v2788_v62, %v2470_v63  ;;  %v2803_v62 = vld [vmem:[%s3107_s16 + $0xb4] sm:$0xf0]  ;;  %v2652_v63 = vld [vmem:[%s3107_s16 + $0x1a8] sm:$0xf] }
 0x212   : > { %v2553_v6 = vor.u32 %v2808_v3, %v2550_v4  ;;  %v2469_v3 = vor.u32 %v2790_v58, %v2468_v57  ;;  %v2597_v4 = vor.u32 %v2822_v61, %v2596_v59  ;;  %v2524_v61 = vld [vmem:[%s3107_s16 + $0xa8] sm:$0xf] }
 0x213   : > { %1887 = vmatpush.bf16.msra.mxu2 %v2533_v14  ;;  %v2582_v14 = vld [vmem:[%s3107_s16 + $0x130] sm:$0xf0]  ;;  %v2525_v0 = vor.u32 %v2803_v62, %v2524_v61  ;;  %v2781_v61 = vld [vmem:[%s3107_s16 + $0xc] sm:$0xf]  ;;  %v2446_v62 = vld [vmem:[%s3107_s16 + $0x18] sm:$0xf0] }
 0x214   : > { %1912 = vmatpush.bf16.msrb.mxu0 %v2553_v6  ;;  %v2452_v6 = vld [vmem:[%s3107_s16 + $0x20] sm:$0xf]  ;;  %v2585_v24 = vor.u32 %v2816_v13, %v2582_v14  ;;  %v2831_v13 = vld [vmem:[%s3107_s16 + $0x194] sm:$0xf0]  ;;  %v2797_v14 = vld [vmem:[%s3107_s16 + $0x8c] sm:$0xf] }
 0x215   : > { %1900 = vmatpush.bf16.msra.mxu3 %v2661_v15  ;;  %v2453_v15 = vor.u32 %v2786_v7, %v2452_v6  ;;  %v2654_v6 = vld [vmem:[%s3107_s16 + $0x1b8] sm:$0xf0] }
 0x217   : > { %1888 = vmatpush.bf16.msra.mxu2 %v2517_v27  ;;  %v2812_v27 = vld [vmem:[%s3107_s16 + $0x104] sm:$0xf] }
 0x218   : > { %1913 = vmatpush.bf16.msrb.mxu0 %v2537_v19  ;;  %v2457_v19 = vor.u32 %v2784_v11, %v2454_v12  ;;  %v2636_v11 = vld [vmem:[%s3107_s16 + $0x188] sm:$0xf] }
 0x219   : > { %1901 = vmatpush.bf16.msra.mxu3 %v2645_v31 }
 0x21b   : > { %1889 = vmatpush.bf16.msra.mxu2 %v2501_v42 }
 0x21c   : > { %1914 = vmatpush.bf16.msrb.mxu0 %v2521_v32  ;;  %v2437_v32 = vor.u32 %v2782_v20, %v2436_v16  ;;  %v2637_v16 = vor.u32 %v2831_v13, %v2636_v11 }
 0x293   : > { %v1291_v44 = vpop.f32.mrf.mxu2 }
 0x294   : > { %v1292_v45 = vadd.f32 %v2889_v43, %v1291_v44  ;;  %v2629_v43 = vor.u32 %v2830_v37, %v2628_v35  ;;  %v2505_v44 = vor.u32 %v2796_v38, %v2502_v39  ;;  %v2809_v35 = vld [vmem:[%s3107_s16 + $0xec] sm:$0xf]  ;;  %v2565_v38 = vor.u32 %v2814_v22, %v2564_v21  ;;  %v2492_v21 = vld [vmem:[%s3107_s16 + $0x68] sm:$0xf]  ;;  %v2795_v22 = vld [vmem:[%s3107_s16 + $0x74] sm:$0xf0] }
 0x295   : > { %v2441_v39 = vor.u32 %v2780_v25, %v2438_v26  ;;  %v2827_v25 = vld [vmem:[%s3107_s16 + $0x174] sm:$0xf0]  ;;  %v2793_v26 = vld [vmem:[%s3107_s16 + $0x6c] sm:$0xf] }
 0x296   : > { %vm1295_vm7 = vcmp.gt.f32.partialorder %v1292_v45, 0.0  ;;  %v1296_v46 = vmul.f32 0.1, %v1292_v45  ;;  %1902 = vmatpush.bf16.msra.mxu3 %v2629_v43  ;;  %1915 = vmatpush.bf16.msrb.mxu0 %v2505_v44  ;;  %v2569_v43 = vor.u32 %v2812_v27, %v2566_v28  ;;  %v2557_v44 = vor.u32 %v2811_v30, %v2556_v29  ;;  %v2494_v27 = vld [vmem:[%s3107_s16 + $0x78] sm:$0xf0] }
 0x297   : > { %v2497_v29 = vor.u32 %v2793_v26, %v2494_v27  ;;  %v2825_v30 = vld [vmem:[%s3107_s16 + $0x16c] sm:$0xf] }
 0x298   : > { %v1297_v47 = vsel %vm1295_vm7, %v1292_v45, %v1296_v46  ;;  %v2484_v45 = vld [vmem:[%s3107_s16 + $0x60] sm:$0xf]  ;;  %v2794_v46 = vld [vmem:[%s3107_s16 + $0x6c] sm:$0xf0] }
 0x299   : > { %v1298_v48 = vpack.c.bf16 %v1297_v47, %v1297_v47  ;;  %v2612_v47 = vld [vmem:[%s3107_s16 + $0x160] sm:$0xf]  ;;  %v2485_v54 = vor.u32 %v2794_v46, %v2484_v45  ;;  %v2685_v45 = vor.u32 %v2843_v34, %v2684_v33  ;;  %v2561_v46 = vor.u32 %v2809_v35, %v2558_v36  ;;  %v2791_v34 = vld [vmem:[%s3107_s16 + $0x54] sm:$0xf0]  ;;  %v2604_v35 = vld [vmem:[%s3107_s16 + $0x148] sm:$0xf] }
 0x29a   : > { %1916 = vmatpush.bf16.msrb.mxu0 %v2489_v56  ;;  %v2670_v56 = vld [vmem:[%s3107_s16 + $0x1d8] sm:$0xf0]  ;;  %v2823_v36 = vld [vmem:[%s3107_s16 + $0x154] sm:$0xf0] }
 0x29b   : > { %v1293_v49 = vpop.f32.mrf.mxu2  ;;  %2369 = vmatmul.msk.bf16.vlgmr.msrb.gmra.mxu3 %vm1335_vm8, %v1298_v48  ;;  %v2633_v48 = vor.u32 %v2828_v40, %v2630_v41  ;;  %1890 = vmatpush.bf16.msra.mxu2 %v2485_v54  ;;  %v2841_v40 = vld [vmem:[%s3107_s16 + $0x1ec] sm:$0xf]  ;;  %v2686_v41 = vld [vmem:[%s3107_s16 + $0x1f8] sm:$0xf0] }
 0x29c   : > { %v2826_v49 = vld [vmem:[%s3107_s16 + $0x16c] sm:$0xf0]  ;;  %v2689_v51 = vor.u32 %v2841_v40, %v2686_v41  ;;  %v2542_v54 = vld [vmem:[%s3107_s16 + $0xd8] sm:$0xf0]  ;;  %v2821_v41 = vld [vmem:[%s3107_s16 + $0x14c] sm:$0xf] }
 0x29d   : > { %v2613_v55 = vor.u32 %v2826_v49, %v2612_v47  ;;  %1928 = vmatpush.bf16.msrb.mxu1 %v2633_v48  ;;  %v2540_v47 = vld [vmem:[%s3107_s16 + $0xc8] sm:$0xf]  ;;  %v2807_v48 = vld [vmem:[%s3107_s16 + $0xd4] sm:$0xf0]  ;;  %v2545_v59 = vor.u32 %v2805_v53, %v2542_v54  ;;  %v2478_v40 = vld [vmem:[%s3107_s16 + $0x58] sm:$0xf0] }
 0x29e   : > { %1917 = vmatpush.bf16.msrb.mxu0 %v2473_v5  ;;  %v2668_v49 = vld [vmem:[%s3107_s16 + $0x1c8] sm:$0xf]  ;;  %v2541_v57 = vor.u32 %v2807_v48, %v2540_v47  ;;  %v2833_v5 = vld [vmem:[%s3107_s16 + $0x1ac] sm:$0xf]  ;;  %v2819_v48 = vld [vmem:[%s3107_s16 + $0x134] sm:$0xf0] }
 0x29f   : > { %1903 = vmatpush.bf16.msra.mxu3 %v2613_v55  ;;  %1891 = vmatpush.bf16.msra.mxu2 %v2469_v3  ;;  %v2837_v55 = vld [vmem:[%s3107_s16 + $0x1cc] sm:$0xf]  ;;  %v2669_v58 = vor.u32 %v2839_v52, %v2668_v49  ;;  %v2653_v3 = vor.u32 %v2835_v1, %v2652_v63  ;;  %v2657_v8 = vor.u32 %v2833_v5, %v2654_v6  ;;  %v2588_v47 = vld [vmem:[%s3107_s16 + $0x128] sm:$0xf]  ;;  %v2590_v53 = vld [vmem:[%s3107_s16 + $0x138] sm:$0xf0] }
 0x2a0   : > { %v2785_v49 = vld [vmem:[%s3107_s16 + $0x2c] sm:$0xf]  ;;  %v2589_v54 = vor.u32 %v2819_v48, %v2588_v47  ;;  %v1372_v5 = vld [vmem:[%s3616_s12] sm:$0x3] }
 0x2a1   : > { %1929 = vmatpush.bf16.msrb.mxu1 %v2617_v60  ;;  %v2673_v60 = vor.u32 %v2837_v55, %v2670_v56  ;;  %v2817_v52 = vld [vmem:[%s3107_s16 + $0x12c] sm:$0xf]  ;;  %v2444_v56 = vld [vmem:[%s3107_s16 + $0x8] sm:$0xf]  ;;  %v1374_v6 = vperm.slane %v1372_v5, 0 }
 0x2a2   : > { %1918 = vmatpush.bf16.msrb.mxu0 %v2457_v19  ;;  %v2638_v19 = vld [vmem:[%s3107_s16 + $0x198] sm:$0xf0]  ;;  %v2813_v63 = vld [vmem:[%s3107_s16 + $0x10c] sm:$0xf] }
 0x2a3   : > { %1904 = vmatpush.bf16.msra.mxu3 %v2597_v4  ;;  %1892 = vmatpush.bf16.msra.mxu2 %v2453_v15  ;;  %v2526_v4 = vld [vmem:[%s3107_s16 + $0xb8] sm:$0xf0] }
 0x2a4   : > { %v2510_v15 = vld [vmem:[%s3107_s16 + $0x98] sm:$0xf0] }
 0x2a5   : > { %1930 = vmatpush.bf16.msrb.mxu1 %v2601_v9  ;;  %v2508_v9 = vld [vmem:[%s3107_s16 + $0x88] sm:$0xf] }
 0x2a6   : > { %1919 = vmatpush.bf16.msrb.mxu0 %v2441_v39  ;;  %v2509_v12 = vor.u32 %v2799_v10, %v2508_v9  ;;  %v2789_v39 = vld [vmem:[%s3107_s16 + $0x4c] sm:$0xf] }
 0x2a7   : > { %1905 = vmatpush.bf16.msra.mxu3 %v2581_v18  ;;  %1893 = vmatpush.bf16.msra.mxu2 %v2437_v32  ;;  %v2829_v18 = vld [vmem:[%s3107_s16 + $0x18c] sm:$0xf]  ;;  %v2476_v32 = vld [vmem:[%s3107_s16 + $0x48] sm:$0xf] }
 0x2a8   : > { %v2641_v20 = vor.u32 %v2829_v18, %v2638_v19 }
 0x2a9   : > { %1931 = vmatpush.bf16.msrb.mxu1 %v2585_v24  ;;  %v2493_v24 = vor.u32 %v2795_v22, %v2492_v21 }
 0x2ab   : > { %1906 = vmatpush.bf16.msra.mxu3 %v2565_v38  ;;  %1938 = vmatpush.bf16.msrb.mxu2 %v2557_v44  ;;  %v2605_v38 = vor.u32 %v2823_v36, %v2604_v35  ;;  %v2460_v44 = vld [vmem:[%s3107_s16 + $0x28] sm:$0xf] }
 0x2ad   : > { %1932 = vmatpush.bf16.msrb.mxu1 %v2569_v43  ;;  %v2606_v43 = vld [vmem:[%s3107_s16 + $0x158] sm:$0xf0] }
 0x2af   : > { %1951 = vmatpush.bf16.msrb.mxu3 %v2685_v45  ;;  %1939 = vmatpush.bf16.msrb.mxu2 %v2541_v57  ;;  %v2787_v45 = vld [vmem:[%s3107_s16 + $0x34] sm:$0xf0] }
 0x2b0   : > { %v2783_v57 = vld [vmem:[%s3107_s16 + $0x14] sm:$0xf0] }
 0x2b1   : > { %v2445_v1 = vor.u32 %v2783_v57, %v2444_v56 }
 0x2b3   : > { %1952 = vmatpush.bf16.msrb.mxu3 %v2669_v58  ;;  %1940 = vmatpush.bf16.msrb.mxu2 %v2525_v0  ;;  %v2572_v58 = vld [vmem:[%s3107_s16 + $0x108] sm:$0xf]  ;;  %v2574_v0 = vld [vmem:[%s3107_s16 + $0x118] sm:$0xf0] }
 0x2b7   : > { %1953 = vmatpush.bf16.msrb.mxu3 %v2653_v3  ;;  %1941 = vmatpush.bf16.msrb.mxu2 %v2509_v12  ;;  %v2449_v3 = vor.u32 %v2781_v61, %v2446_v62 }
 0x2bb   : > { %1954 = vmatpush.bf16.msrb.mxu3 %v2637_v16  ;;  %1942 = vmatpush.bf16.msrb.mxu2 %v2493_v24 }
 0x31e   : > { %v1348_v17 = vpop.f32.mrf.mxu3 }
 0x31f   : > { %v1349_v23 = vadd.f32 %v2890_v2, %v1348_v17  ;;  %v2801_v2 = vld [vmem:[%s3107_s16 + $0xac] sm:$0xf]  ;;  %v2513_v17 = vor.u32 %v2797_v14, %v2510_v15 }
 0x320   : > { %v2529_v7 = vor.u32 %v2801_v2, %v2526_v4  ;;  %v2577_v4 = vor.u32 %v2813_v63, %v2574_v0 }
 0x321   : > { %vm1352_vm9 = vcmp.gt.f32.partialorder %v1349_v23, 0.0  ;;  %v1353_v31 = vmul.f32 0.1, %v1349_v23 }
 0x323   : > { %v1354_v37 = vsel %vm1352_vm9, %v1349_v23, %v1353_v31  ;;  %v2620_v23 = vld [vmem:[%s3107_s16 + $0x168] sm:$0xf]  ;;  %v2622_v31 = vld [vmem:[%s3107_s16 + $0x178] sm:$0xf0] }
 0x324   : > { %v1355_v42 = vpack.c.bf16 %v1354_v37, %v1354_v37  ;;  %v2621_v28 = vor.u32 %v2827_v25, %v2620_v23  ;;  %v2625_v33 = vor.u32 %v2825_v30, %v2622_v31  ;;  %v2477_v37 = vor.u32 %v2791_v34, %v2476_v32 }
 0x326   : > { %v1350_v50 = vpop.f32.mrf.mxu3  ;;  %1466 = vmatmul.bf16.vlgmr.msra.gmra.mxu0 %v1355_v42  ;;  %1479 = vmatmul.bf16.vlgmr.msra.gmra.mxu1 %v1355_v42  ;;  %v2481_v42 = vor.u32 %v2789_v39, %v2478_v40 }
 0x327   : > { %1964 = vmatpush.bf16.msra.mxu0 %v2561_v46  ;;  %1977 = vmatpush.bf16.msra.mxu1 %v2689_v51  ;;  %v2609_v46 = vor.u32 %v2821_v41, %v2606_v43  ;;  %v2461_v50 = vor.u32 %v2787_v45, %v2460_v44  ;;  %v2462_v51 = vld [vmem:[%s3107_s16 + $0x38] sm:$0xf0] }
 0x328   : > { %1955 = vmatpush.bf16.msrb.mxu3 %v2621_v28  ;;  %1943 = vmatpush.bf16.msrb.mxu2 %v2477_v37  ;;  %v2465_v55 = vor.u32 %v2785_v49, %v2462_v51 }
 0x32b   : > { %1965 = vmatpush.bf16.msra.mxu0 %v2545_v59  ;;  %1978 = vmatpush.bf16.msra.mxu1 %v2673_v60  ;;  %v2593_v59 = vor.u32 %v2817_v52, %v2590_v53  ;;  %v2815_v60 = vld [vmem:[%s3107_s16 + $0x114] sm:$0xf0]  ;;  %s3632_s16 = sadd.s32 4294967295, %s2955_s21   ;;  %s3634_s21 = sld [smem:[#allocation9_spill]] }
 0x32c   : > { %1956 = vmatpush.bf16.msrb.mxu3 %v2605_v38  ;;  %1944 = vmatpush.bf16.msrb.mxu2 %v2461_v50  ;;  %v2573_v2 = vor.u32 %v2815_v60, %v2572_v58  ;;  %s2079_s23 = sshll.u32 %s3632_s16, 2 }
 0x32d   : > { %p528_p6 = scmp.lt.s32.totalorder %s2079_s23, 7 }
 0x32f   : > { %1966 = vmatpush.bf16.msra.mxu0 %v2529_v7  ;;  %1979 = vmatpush.bf16.msra.mxu1 %v2657_v8  ;;  %v1375_v7 = vperm.slane %v1372_v5, 1  ;;  %s3642_s23 = smov (!%p528_p6, %s2079_s23), 7 }
 0x330   : > { %1957 = vmatpush.bf16.msrb.mxu3 %v2589_v54  ;;  %1945 = vmatpush.bf16.msrb.mxu2 %v2445_v1  ;;  %s530_s28 = scalar_lea.vmem %s3633_s29, %s3642_s23  ;;  %s2081_s18 = sshll.u32 %s3642_s23, 3 }
 0x331   : > { %s536_s14 = scalar_lea.vmem %s3634_s21, %s2081_s18 }
 0x333   : > { %1967 = vmatpush.bf16.msra.mxu0 %v2513_v17  ;;  %1980 = vmatpush.bf16.msra.mxu1 %v2641_v20  ;;  %v1556_v20 = vld [vmem:[%s530_s28] sm:$0xf] }
 0x334   : > { %1958 = vmatpush.bf16.msrb.mxu3 %v2573_v2  ;;  %v1559_v23 = vperm.slane %v1556_v20, 1  ;;  %v1558_v24 = vperm.slane %v1556_v20, 0  ;;  %v1561_v37 = vperm.slane %v1556_v20, 3  ;;  %v1560_v38 = vperm.slane %v1556_v20, 2 }
 0x337   : > { %1968 = vmatpush.bf16.msra.mxu0 %v2497_v29  ;;  %1981 = vmatpush.bf16.msra.mxu1 %v2625_v33 }
 0x33b   : > { %1969 = vmatpush.bf16.msra.mxu0 %v2481_v42  ;;  %1982 = vmatpush.bf16.msra.mxu1 %v2609_v46 }
 0x33f   : > { %1970 = vmatpush.bf16.msra.mxu0 %v2465_v55  ;;  %1983 = vmatpush.bf16.msra.mxu1 %v2593_v59 }
 0x343   : > { %1971 = vmatpush.bf16.msra.mxu0 %v2449_v3  ;;  %1984 = vmatpush.bf16.msra.mxu1 %v2577_v4 }
 0x3a3   : > { %v1467_v8 = vpop.f32.mrf.mxu0  ;;  %v1480_v9 = vpop.f32.mrf.mxu1 }
 0x3a4   : > { %v1468_v10 = vadd.f32 %v1467_v8, %v1374_v6  ;;  %v1481_v11 = vadd.f32 %v1480_v9, %v1375_v7 }
 0x3a6   : > { %vm1484_vm10 = vcmp.gt.f32.partialorder %v1468_v10, 0.0  ;;  %v1486_v12 = vmul.f32 0.1, %v1468_v10  ;;  %vm1485_vm11 = vcmp.gt.f32.partialorder %v1481_v11, 0.0  ;;  %v1487_v13 = vmul.f32 0.1, %v1481_v11 }
 0x3a8   : > { %v1488_v14 = vsel %vm1484_vm10, %v1468_v10, %v1486_v12  ;;  %v1489_v15 = vsel %vm1485_vm11, %v1481_v11, %v1487_v13 }
 0x3a9   : > { %v1490_v16 = vpack.c.bf16 %v1488_v14, %v1488_v14  ;;  %v1491_v17 = vpack.c.bf16 %v1489_v15, %v1489_v15 }
 0x3ab   : > { %v1469_v18 = vpop.f32.mrf.mxu0  ;;  %v1482_v19 = vpop.f32.mrf.mxu1  ;;  %1894 = vmatmul.bf16.vlgmr.msra.gmra.mxu2 %v1490_v16  ;;  %1907 = vmatmul.bf16.vlgmr.msra.gmra.mxu3 %v1491_v17 }
 0x3ac   : > { %1920 = vmatmul.bf16.vlgmr.msrb.gmra.mxu0 %v1490_v16  ;;  %1933 = vmatmul.bf16.vlgmr.msrb.gmra.mxu1 %v1491_v17 }
 0x3bb   : > { %1946 = vmatmul.bf16.vlgmr.msrb.gmra.mxu2 %v1490_v16  ;;  %1959 = vmatmul.bf16.vlgmr.msrb.gmra.mxu3 %v1491_v17 }
 0x3bc   : > { %1972 = vmatmul.bf16.vlgmr.msra.gmra.mxu0 %v1490_v16  ;;  %1985 = vmatmul.bf16.vlgmr.msra.gmra.mxu1 %v1491_v17 }
 0x429   : > { %v1921_v21 = vpop.f32.mrf.mxu0  ;;  %v1934_v22 = vpop.f32.mrf.mxu1 }
 0x42a   : > { %v1922_v25 = vadd.f32 %v1921_v21, %v1559_v23 }
 0x42c   : > { %v1935_v32 = vadd.f32 %v1934_v22, %v1922_v25 }
 0x42e   : > { %v1895_v26 = vpop.f32.mrf.mxu2  ;;  %v1908_v27 = vpop.f32.mrf.mxu3  ;;  %1991 = vst [vmem:[%s536_s14 + $0x8] sm:$0xff] %v1935_v32 }
 0x42f   : > { %v1896_v28 = vadd.f32 %v1895_v26, %v1558_v24 }
 0x431   : > { %v1909_v29 = vadd.f32 %v1908_v27, %v1896_v28  ;;  %v1923_v30 = vpop.f32.mrf.mxu0  ;;  %v1936_v31 = vpop.f32.mrf.mxu1 }
 0x433   : > { %1990 = vst [vmem:[%s536_s14] sm:$0xff] %v1909_v29 }
 0x436   : > { %v1897_v33 = vpop.f32.mrf.mxu2  ;;  %v1910_v34 = vpop.f32.mrf.mxu3 }
 0x439   : > { %v1973_v35 = vpop.f32.mrf.mxu0  ;;  %v1986_v36 = vpop.f32.mrf.mxu1 }
 0x43a   : > { %v1974_v39 = vadd.f32 %v1973_v35, %v1561_v37 }
 0x43c   : > { %v1987_v46 = vadd.f32 %v1986_v36, %v1974_v39 }
 0x43e   : > { %v1947_v40 = vpop.f32.mrf.mxu2  ;;  %v1960_v41 = vpop.f32.mrf.mxu3  ;;  %1993 = vst [vmem:[%s536_s14 + $0x18] sm:$0xff] %v1987_v46 }
 0x43f   : > { %v1948_v42 = vadd.f32 %v1947_v40, %v1560_v38 }
 0x441   : > { %v1961_v43 = vadd.f32 %v1960_v41, %v1948_v42  ;;  %v1975_v44 = vpop.f32.mrf.mxu0  ;;  %v1988_v45 = vpop.f32.mrf.mxu1 }
 0x443   : > { %1992 = vst [vmem:[%s536_s14 + $0x10] sm:$0xff] %v1961_v43 }
 0x446   : > { %v1949_v47 = vpop.f32.mrf.mxu2  ;;  %v1962_v48 = vpop.f32.mrf.mxu3 }
 0x447 PF: > { %s3635_s21 = sld [smem:[#allocation6_spill]]  ;;  %s3638_s18 = smov %s2947_s19 }
 0x448   : > { %s3636_s20 = sld [smem:[#allocation5_spill]] }
 0x449   : > { %s3637_s17 = sld [smem:[#allocation7_spill]] }
 0x44d   : > { %p25_p7 = scmp.ge.s32.totalorder %s3635_s21, 4  }
 0x44e   : > { %s3639_s19 = smov %s3636_s20 }
 0x44f   : > { %s3640_s20 = smov %s3637_s17  ;;  %27 = sbr.rel (!%p25_p7) target bundleno = 6 (0x6), region = 123 }
 0x454   :  { %2016 = vsyncpa [#allocation3], 1 }
 0x455   :  { %2018 = vsyncpa [#allocation3 + $0x1], 1 }

</bundles_post_ra>
